<compile_context>
chip_gen: v5e
topology: v5e:2x2
jax: 0.10.0
libtpu: 0.0.40
codegen_flags: <defaults>
</compile_context>

<pallas_src>
import math

import jax
import jax.numpy as jnp
from jax.experimental import pallas as pl
from jax.experimental.pallas import tpu as pltpu


# Use the MXU only when the contraction dim actually fills a meaningful fraction of it.
_MXU_MIN_F = 128


def _embedding_kernel_mxu(x_ref, w_ref, b_ref, o_ref):
    # x_ref: (tm, F), w_ref: (F, D), b_ref: (1, D), o_ref: (tm, D)
    acc = jnp.dot(x_ref[...], w_ref[...], preferred_element_type=jnp.float32)
    o_ref[...] = (acc + b_ref[...].astype(jnp.float32)).astype(o_ref.dtype)


def _embedding_kernel_vpu(x_ref, w_ref, b_ref, o_ref):
    # Tiny-F path: unrolled broadcast multiply-add on the VPU; avoids a >96%-padded
    # MXU contraction.  F is static and small, so the Python loop fully unrolls.
    x = x_ref[...].astype(jnp.float32)          # (tm, F)
    w = w_ref[...].astype(jnp.float32)          # (F, D)
    tm, f_dim = x.shape
    d_dim = w.shape[1]
    acc = jnp.broadcast_to(b_ref[...].astype(jnp.float32), (tm, d_dim))
    for f in range(f_dim):
        acc = acc + x[:, f:f + 1] * w[f:f + 1, :]
    o_ref[...] = acc.astype(o_ref.dtype)


def _round_up(v, m):
    return ((v + m - 1) // m) * m


def _choose_tile_m(M, F, D, itemsize, vmem_budget_bytes=8 * 1024 * 1024):
    """Largest row-tile that keeps the double-buffered x/out slabs inside a conservative
    VMEM budget (safe under v5e's 16 MiB default scoped VMEM and v7x's 64 MiB physical)."""
    f_pad = _round_up(F, 128)                   # lane padding of the VMEM tile
    d_pad = _round_up(D, 128)
    per_row = 2 * (f_pad + d_pad) * itemsize    # 2 pipeline buffers each for x and out
    tm = vmem_budget_bytes // per_row
    tm = max(8, min(tm, 2048, _round_up(M, 8)))
    return (tm // 8) * 8                        # sublane-aligned


def data_embedding(x, weight, bias, *, tm=None):
    """Pallas implementation of DataEmbedding.forward.

    Args:
      x:      (B, L, F)
      weight: (D, F, 1)  -- PyTorch Conv1d weight layout
      bias:   (D,)
    Returns:
      (B, L, D) with x.dtype
    """
    B, L, F = x.shape
    D = weight.shape[0]
    M = B * L

    x2d = x.reshape(M, F)                       # (M, F), features on the lane axis
    w_t = jnp.transpose(weight[:, :, 0])        # (F, D)
    b2d = bias.reshape(1, D).astype(jnp.float32)

    itemsize = jnp.dtype(x.dtype).itemsize
    if tm is None:
        tm = _choose_tile_m(M, F, D, itemsize)
    grid_m = pl.cdiv(M, tm)

    kernel = _embedding_kernel_mxu if F >= _MXU_MIN_F else _embedding_kernel_vpu

    cost = pl.CostEstimate(
        flops=2 * M * F * D,
        bytes_accessed=(M * F + F * D + D) * itemsize + M * D * itemsize,
        transcendentals=0,
    )

    out2d = pl.pallas_call(
        kernel,
        out_shape=jax.ShapeDtypeStruct((M, D), x.dtype),
        grid_spec=pl.GridSpec(
            grid=(grid_m,),
            in_specs=[
                pl.BlockSpec((tm, F), lambda i: (i, 0)),   # streamed row tiles
                pl.BlockSpec((F, D), lambda i: (0, 0)),    # resident weight
                pl.BlockSpec((1, D), lambda i: (0, 0)),    # resident bias
            ],
            out_specs=pl.BlockSpec((tm, D), lambda i: (i, 0)),
        ),
        compiler_params=pltpu.CompilerParams(
            dimension_semantics=("parallel",),             # megacore sharding on v7x
            vmem_limit_bytes=32 * 1024 * 1024,             # <= physical VMEM on v5e/v6e/v7x
        ),
        cost_estimate=cost,
    )(x2d, w_t, b2d)

    return out2d.reshape(B, L, D)


def init_params(key, model_dim, feature_num):
    """Deterministic param init mirroring the PyTorch module's __init__."""
    k_w, k_b = jax.random.split(key)

    # kaiming_normal_(mode='fan_in', nonlinearity='leaky_relu'):
    #   fan_in = feature_num * kernel_size = feature_num
    #   gain   = sqrt(2 / (1 + 0.01^2))   (default negative_slope=0.01)
    fan_in = feature_num * 1
    gain = math.sqrt(2.0 / (1.0 + 0.01 ** 2))
    std = gain / math.sqrt(fan_in)
    weight = std * jax.random.normal(k_w, (model_dim, feature_num, 1), jnp.float32)

    # PyTorch Conv1d default bias init: U(-1/sqrt(fan_in), 1/sqrt(fan_in))
    bound = 1.0 / math.sqrt(fan_in)
    bias = jax.random.uniform(
        k_b, (model_dim,), jnp.float32, minval=-bound, maxval=bound
    )
    return weight, bias


if __name__ == "__main__":
    key = jax.random.PRNGKey(0)
    k_x, k_p = jax.random.split(key)

    batch, seq_len, feature_num, model_dim = 2, 8, 4, 32

    x = jax.random.normal(k_x, (batch, seq_len, feature_num), jnp.float32)
    weight, bias = init_params(k_p, model_dim, feature_num)

    out = data_embedding(x, weight, bias)
    out = jax.block_until_ready(out)

    # Reference check in plain JAX (same math as the PyTorch conv1d k=1).
    ref = jnp.einsum("blf,df->bld", x, weight[:, :, 0]) + bias[None, None, :]
    assert out.shape == (batch, seq_len, model_dim)
    assert jnp.allclose(out, ref, atol=1e-5, rtol=1e-5)

    print("KERNEL_OK")
</pallas_src>

<mosaic_0001>
module attributes {stable_mosaic.version = 11 : i64} {
  func.func @_embedding_kernel_vpu(%arg0: i32, %arg1: memref<16x4xf32, #tpu.memory_space<vmem>>, %arg2: memref<4x32xf32, #tpu.memory_space<vmem>>, %arg3: memref<1x32xf32, #tpu.memory_space<vmem>>, %arg4: memref<16x32xf32, #tpu.memory_space<vmem>>) attributes {dimension_semantics = [#tpu.dimension_semantics<parallel>], iteration_bounds = array<i64: 1>, scalar_prefetch = 0 : i64, scratch_operands = 0 : i64, tpu.core_type = #tpu.core_type<tc>, window_params = [{transform_indices = @transform_0, window_bounds = array<i64: 16, 4>}, {pipeline_mode = #tpu.pipeline_mode<synchronous>, transform_indices = @transform_1, window_bounds = array<i64: 4, 32>}, {pipeline_mode = #tpu.pipeline_mode<synchronous>, transform_indices = @transform_2, window_bounds = array<i64: 1, 32>}, {transform_indices = @transform_3, window_bounds = array<i64: 16, 32>}]} {
    %c0 = arith.constant 0 : index
    %c0_0 = arith.constant 0 : index
    %0 = vector.load %arg1[%c0, %c0_0] : memref<16x4xf32, #tpu.memory_space<vmem>>, vector<16x4xf32>
    %c0_1 = arith.constant 0 : index
    %c0_2 = arith.constant 0 : index
    %1 = vector.load %arg2[%c0_1, %c0_2] : memref<4x32xf32, #tpu.memory_space<vmem>>, vector<4x32xf32>
    %c0_3 = arith.constant 0 : index
    %c0_4 = arith.constant 0 : index
    %2 = vector.load %arg3[%c0_3, %c0_4] : memref<1x32xf32, #tpu.memory_space<vmem>>, vector<1x32xf32>
    %3 = vector.shape_cast %2 : vector<1x32xf32> to vector<1x32xf32>
    %4 = vector.broadcast %3 : vector<1x32xf32> to vector<16x32xf32>
    %5 = vector.extract_strided_slice %0 {offsets = [0, 0], sizes = [16, 1], strides = [1, 1]} : vector<16x4xf32> to vector<16x1xf32>
    %6 = vector.extract_strided_slice %1 {offsets = [0, 0], sizes = [1, 32], strides = [1, 1]} : vector<4x32xf32> to vector<1x32xf32>
    %7 = vector.broadcast %5 : vector<16x1xf32> to vector<16x32xf32>
    %8 = vector.broadcast %6 : vector<1x32xf32> to vector<16x32xf32>
    %9 = arith.mulf %7, %8 : vector<16x32xf32>
    %10 = arith.addf %4, %9 : vector<16x32xf32>
    %11 = vector.extract_strided_slice %0 {offsets = [0, 1], sizes = [16, 1], strides = [1, 1]} : vector<16x4xf32> to vector<16x1xf32>
    %12 = vector.extract_strided_slice %1 {offsets = [1, 0], sizes = [1, 32], strides = [1, 1]} : vector<4x32xf32> to vector<1x32xf32>
    %13 = vector.broadcast %11 : vector<16x1xf32> to vector<16x32xf32>
    %14 = vector.broadcast %12 : vector<1x32xf32> to vector<16x32xf32>
    %15 = arith.mulf %13, %14 : vector<16x32xf32>
    %16 = arith.addf %10, %15 : vector<16x32xf32>
    %17 = vector.extract_strided_slice %0 {offsets = [0, 2], sizes = [16, 1], strides = [1, 1]} : vector<16x4xf32> to vector<16x1xf32>
    %18 = vector.extract_strided_slice %1 {offsets = [2, 0], sizes = [1, 32], strides = [1, 1]} : vector<4x32xf32> to vector<1x32xf32>
    %19 = vector.broadcast %17 : vector<16x1xf32> to vector<16x32xf32>
    %20 = vector.broadcast %18 : vector<1x32xf32> to vector<16x32xf32>
    %21 = arith.mulf %19, %20 : vector<16x32xf32>
    %22 = arith.addf %16, %21 : vector<16x32xf32>
    %23 = vector.extract_strided_slice %0 {offsets = [0, 3], sizes = [16, 1], strides = [1, 1]} : vector<16x4xf32> to vector<16x1xf32>
    %24 = vector.extract_strided_slice %1 {offsets = [3, 0], sizes = [1, 32], strides = [1, 1]} : vector<4x32xf32> to vector<1x32xf32>
    %25 = vector.broadcast %23 : vector<16x1xf32> to vector<16x32xf32>
    %26 = vector.broadcast %24 : vector<1x32xf32> to vector<16x32xf32>
    %27 = arith.mulf %25, %26 : vector<16x32xf32>
    %28 = arith.addf %22, %27 : vector<16x32xf32>
    %c0_5 = arith.constant 0 : index
    %c0_6 = arith.constant 0 : index
    %29 = vector.load %arg4[%c0_5, %c0_6] : memref<16x32xf32, #tpu.memory_space<vmem>>, vector<16x32xf32>
    tpu.vector_store %arg4[%c0_5, %c0_6], %28 {strides = array<i32>} : memref<16x32xf32, #tpu.memory_space<vmem>>, vector<16x32xf32>,
    return
  }
  func.func @transform_0(%arg0: i32) -> (i32, i32) {
    %c0_i32 = arith.constant 0 : i32
    %c0_i32_0 = arith.constant 0 : i32
    return %arg0, %c0_i32 : i32, i32
  }
  func.func @transform_1(%arg0: i32) -> (i32, i32) {
    %c0_i32 = arith.constant 0 : i32
    %c0_i32_0 = arith.constant 0 : i32
    %c0_i32_1 = arith.constant 0 : i32
    return %c0_i32, %c0_i32_0 : i32, i32
  }
  func.func @transform_2(%arg0: i32) -> (i32, i32) {
    %c0_i32 = arith.constant 0 : i32
    %c0_i32_0 = arith.constant 0 : i32
    %c0_i32_1 = arith.constant 0 : i32
    return %c0_i32, %c0_i32_0 : i32, i32
  }
  func.func @transform_3(%arg0: i32) -> (i32, i32) {
    %c0_i32 = arith.constant 0 : i32
    %c0_i32_0 = arith.constant 0 : i32
    return %arg0, %c0_i32 : i32, i32
  }
}

</mosaic_0001>

<bundles_post_ra>
// kernel: tpu_custom_call.1
= control target key start
LH: loop header
LB: loop body
LE: loop exit
PB: predicated region body
PF: predicated region fallthrough
CT: control target
= control target key end

     0   :  { %v136_v1 = vmov 1   ;;  %v137_v2 = vmov 0   ;;  %s178_s0 = inlined_call_operand.vmem [shape: f32[16,4], index: 0, kind: input, shape index: {}]   ;;  %s179_s1 = inlined_call_operand.vmem [shape: f32[4,32], index: 1, kind: input, shape index: {}]   ;;  %s180_s2 = inlined_call_operand.vmem [shape: f32[1,32], index: 2, kind: input, shape index: {}]   ;;  %s181_s3 = inlined_call_operand.hbm [shape: f32[16,32], index: 3, kind: output, shape index: {}]  }
   0x1   :  { %v15_v0 = vld [vmem:[%s178_s0] sm:$0xff]  ;;  %105 = vset.pattern.permute.xlu1 %v136_v1  ;;  %104 = vset.pattern.permute.xlu0 %v137_v2 }
   0x2   :  { %8 = vsyncpa [#allocation3], 0  ;;  %38 = vperm.xlu1 %105, %v15_v0   ;;  %24 = vperm.xlu0 %104, %v15_v0   ;;  %v138_v3 = vmov 2   ;;  %v16_v4 = vld [vmem:[%s178_s0 + $0x8] sm:$0xff]  ;;  %v139_v5 = vmov 3   ;;  %s140_s0 = smov [#allocation2]  }
   0x3   :  { %106 = vset.pattern.permute.xlu2 %v138_v3  ;;  %v17_v6 = vld [vmem:[%s179_s1] sm:$0xf]  ;;  %s83_s1 = sshll.u32 %s140_s0, 4  ;;  %s85_s21 = sshll.u32 %s181_s3, 4  ;;  %vm76_vm0 = vcmask 261120   ;;  %s84_s1 = int_to_ptr.vmem [resolvable:$true] %s83_s1  ;;  %s86_s21 = int_to_ptr.hbm [resolvable:$true] %s85_s21 }
   0x4   :  { %51 = vperm.xlu2 %106, %v15_v0   ;;  %v32_v9 = vperm.slane %v17_v6, 0  ;;  %v109_v11 = vld [vmem:[%s180_s2] ss:$0 sm:$0xff]  ;;  %v45_v13 = vperm.slane %v17_v6, 1  ;;  %v58_v17 = vperm.slane %v17_v6, 2  ;;  %v71_v26 = vperm.slane %v17_v6, 3 }
   0x5   :  { %s141_s22 = smov 128   ;;  %s142_s23 = smov 8  }
   0xa   :  { %42 = vperm.xlu1 %105, %v16_v4   ;;  %29 = vperm.xlu0 %104, %v16_v4  }
   0xc   :  { %55 = vperm.xlu2 %106, %v16_v4  }
  0x12   :  { %108 = vset.pattern.permute.xlu1 %v139_v5  ;;  %107 = vset.pattern.permute.xlu0 %v139_v5 }
  0x13   :  { %68 = vperm.xlu1 %108, %v16_v4   ;;  %64 = vperm.xlu0 %107, %v15_v0  }
  0x5e   :  { %v52_v10 = vpop.permute.xlu2 %51 }
  0x5f   :  { %v59_v23 = vmul.f32 %v58_v17, %v52_v10 }
  0x66   :  { %v56_v22 = vpop.permute.xlu2 %55 }
  0x67   :  { %v60_v27 = vmul.f32 %v58_v17, %v56_v22 }
  0x74   :  { %v39_v7 = vpop.permute.xlu1 %38  ;;  %v25_v8 = vpop.permute.xlu0 %24 }
  0x75   :  { %v33_v12 = vmul.f32 %v32_v9, %v25_v8  ;;  %v46_v20 = vmul.f32 %v45_v13, %v39_v7 }
  0x77   :  { %v35_v18 = vadd.f32 %v109_v11, %v33_v12 }
  0x79   :  { %v48_v24 = vadd.f32 %v46_v20, %v35_v18 }
  0x7b   :  { %v61_v32 = vadd.f32 %v59_v23, %v48_v24 }
  0x7c   :  { %v43_v14 = vpop.permute.xlu1 %42  ;;  %v30_v15 = vpop.permute.xlu0 %29 }
  0x7d   :  { %v34_v16 = vmul.f32 %v32_v9, %v30_v15  ;;  %v47_v21 = vmul.f32 %v45_v13, %v43_v14 }
  0x7f   :  { %v36_v19 = vadd.f32 %v109_v11, %v34_v16 }
  0x81   :  { %v49_v25 = vadd.f32 %v47_v21, %v36_v19 }
  0x83   :  { %v62_v30 = vadd.f32 %v60_v27, %v49_v25 }
  0x85   :  { %v69_v28 = vpop.permute.xlu1 %68  ;;  %v65_v29 = vpop.permute.xlu0 %64 }
  0x86   :  { %v73_v31 = vmul.f32 %v71_v26, %v69_v28  ;;  %v72_v33 = vmul.f32 %v71_v26, %v65_v29 }
  0x88   :  { %v75_v34 = vadd.f32 %v73_v31, %v62_v30  ;;  %v74_v35 = vadd.f32 %v72_v33, %v61_v32 }
  0x8a   :  { %78 = vst.msk [vmem:[#allocation2 + $0x8] sm:$0xff] %vm76_vm0, %v75_v34 }
  0x8b   :  { %77 = vst.msk [vmem:[#allocation2] sm:$0xff] %vm76_vm0, %v74_v35 }
  0x8c   :  { %91 = dma.vmem_to_hbm [thread:$0]  %s84_s1, 256, %s86_s21, [#allocation3], %s141_s22, %s141_s22, %s142_s23  }
  0x8d   :  { %134 = dma.done.wait [#allocation3], 256  }
  0x8e   :  { %135 = vsyncadd [#allocation3], 4294967040 }
  0x8f   :  { %96 = vsyncpa [#allocation3], 1 }

</bundles_post_ra>
